<compile_context>
chip_gen: v6e
topology: v6e:2x2x1
jax: 0.10.0
libtpu: 0.0.40
codegen_flags: <defaults>
</compile_context>

<pallas_src>
import functools

import jax
import jax.numpy as jnp
from jax.experimental import pallas as pl
from jax.experimental.pallas import tpu as pltpu


def rcab_kernel(x_ref, mask_ref, w1_ref, b1_ref, w2_ref, b2_ref,
                wd_ref, bd_ref, wu_ref, bu_ref, o_ref, *, H, W):
    HW = H * W
    x = x_ref[0]                                          # (C, HW) f32, lane-dense

    def im2col(a):
        """(C, HW) f32 -> (9*C, HW) bf16 column matrix of a 3x3 / pad=1 conv."""
        cols = []
        t = 0
        for dy in range(3):
            for dx in range(3):
                off = (dy - 1) * W + (dx - 1)             # flat-index tap offset
                if off == 0:                              # center tap: as-is
                    cols.append(a)
                else:
                    # circular lane roll (XLU, overlaps with MXU/VPU work),
                    # then zero the wrapped-around border positions.
                    rolled = pltpu.roll(a, shift=(-off) % HW, axis=1)
                    cols.append(rolled * mask_ref[t:t + 1, :])
                t += 1
        # Each piece has C rows (a multiple of the 8-row sublane tile), so this
        # concat is plain vreg stacking; single cast to bf16 feeds the MXU.
        return jnp.concatenate(cols, axis=0).astype(jnp.bfloat16)

    # ---- conv1 (3x3, pad=1) as a single MXU matmul, then ReLU ----
    h1 = jnp.dot(w1_ref[...], im2col(x),
                 preferred_element_type=jnp.float32) + b1_ref[...]
    h1 = jnp.maximum(h1, 0.0)                             # (C, HW)

    # ---- conv2 (3x3, pad=1) as a single MXU matmul ----
    fea = jnp.dot(w2_ref[...], im2col(h1),
                  preferred_element_type=jnp.float32) + b2_ref[...]   # x_fea

    # ---- channel attention ----
    # squeeze conv is linear -> fold the global average pool through it.
    zfull = jnp.dot(wd_ref[...], fea, preferred_element_type=jnp.float32)   # (4, HW)
    z = jnp.maximum(jnp.mean(zfull, axis=1, keepdims=True) + bd_ref[...], 0.0)  # (4, 1)
    e = jnp.dot(wu_ref[...], jnp.broadcast_to(z, (z.shape[0], HW)),
                preferred_element_type=jnp.float32) + bu_ref[...]           # (C, HW)
    att = pl.reciprocal(1.0 + jnp.exp(-e), approx=True)                     # sigmoid

    # ---- residual: x + x_fea * x_cha  (lane-dense unmasked stores) ----
    o_ref[0] = (x + fea * att).astype(o_ref.dtype)


def _tap_masks(H, W):
    """(9, H*W) f32 validity masks for the 9 taps after a circular lane roll."""
    y = jnp.arange(H)[:, None]
    x = jnp.arange(W)[None, :]
    rows = []
    for dy in range(3):
        for dx in range(3):
            m = ((y + dy - 1 >= 0) & (y + dy - 1 < H) &
                 (x + dx - 1 >= 0) & (x + dx - 1 < W))
            rows.append(m.reshape(-1))
    return jnp.stack(rows).astype(jnp.float32)


def rcab_pallas(x_nchw, kparams):
    """x_nchw: (N, C, H, W) float32.  kparams in kernel layout (see __main__)."""
    w1, b1, w2, b2, wd, bd, wu, bu = kparams
    N, C, H, W = x_nchw.shape
    HW = H * W
    xf = x_nchw.reshape(N, C, HW)            # free reshape (no transpose, no pad)
    masks = _tap_masks(H, W)                 # (9, HW) f32, static per (H, W)

    def wspec(a):
        return pl.BlockSpec(a.shape, lambda b: (0, 0))

    grid_spec = pltpu.PrefetchScalarGridSpec(
        num_scalar_prefetch=0,
        grid=(N,),
        in_specs=[
            pl.BlockSpec((1, C, HW), lambda b: (b, 0, 0)),
            wspec(masks),
            wspec(w1), wspec(b1), wspec(w2), wspec(b2),
            wspec(wd), wspec(bd), wspec(wu), wspec(bu),
        ],
        out_specs=pl.BlockSpec((1, C, HW), lambda b: (b, 0, 0)),
    )

    out = pl.pallas_call(
        functools.partial(rcab_kernel, H=H, W=W),
        out_shape=jax.ShapeDtypeStruct((N, C, HW), x_nchw.dtype),
        grid_spec=grid_spec,
        compiler_params=pltpu.CompilerParams(
            dimension_semantics=("parallel",),   # batch elems independent (v7x 2 TCs)
            vmem_limit_bytes=64 * 1024 * 1024,
        ),
    )(xf, masks, w1, b1, w2, b2, wd, bd, wu, bu)
    # TODO(synk): for large H*W*C that exceed VMEM (v7x: 64 MiB) add a spatial
    # row-tile grid axis with a 1-row halo instead of whole-image blocks.
    return out.reshape(N, C, H, W)           # free reshape back to NCHW


def rcab_ref(x, params):
    """Pure-JAX NCHW reference mirroring the PyTorch module exactly."""
    w1, b1, w2, b2, wd, bd, wu, bu = params   # PyTorch OIHW layout
    def conv(inp, w, b):
        y = jax.lax.conv_general_dilated(
            inp, w, window_strides=(1, 1), padding=((1, 1), (1, 1)),
            dimension_numbers=("NCHW", "OIHW", "NCHW"),
            precision=jax.lax.Precision.HIGHEST)
        return y + b[None, :, None, None]
    fea = jnp.maximum(conv(x, w1, b1), 0.0)
    fea = conv(fea, w2, b2)
    pooled = jnp.mean(fea, axis=(2, 3), keepdims=True)
    z = jnp.maximum(conv(pooled, wd, bd), 0.0)
    att = jax.nn.sigmoid(conv(z, wu, bu))
    return x + fea * att


if __name__ == "__main__":
    N, C, H, W = 2, 16, 16, 16          # num_feats=16 (small analogue of 64)
    key = jax.random.PRNGKey(0)
    keys = jax.random.split(key, 9)
    s = 0.1
    x = jax.random.normal(keys[0], (N, C, H, W), jnp.float32)
    # PyTorch-layout parameters (OIHW), deterministic synthetic init
    w1_t = jax.random.normal(keys[1], (C, C, 3, 3), jnp.float32) * s
    b1_t = jax.random.normal(keys[2], (C,), jnp.float32) * s
    w2_t = jax.random.normal(keys[3], (C, C, 3, 3), jnp.float32) * s
    b2_t = jax.random.normal(keys[4], (C,), jnp.float32) * s
    wd_t = jax.random.normal(keys[5], (4, C, 3, 3), jnp.float32) * s
    bd_t = jax.random.normal(keys[6], (4,), jnp.float32) * s
    wu_t = jax.random.normal(keys[7], (C, 4, 3, 3), jnp.float32) * s
    bu_t = jax.random.normal(keys[8], (C,), jnp.float32) * s

    def conv_w(w_oihw):
        # (Co, Ci, ky, kx) -> (Co, ky, kx, Ci) -> (Co, 9*Ci): rows match the
        # tap-major / channel-minor order of im2col; bf16 for the MXU.
        Co, Ci = w_oihw.shape[0], w_oihw.shape[1]
        return (jnp.transpose(w_oihw, (0, 2, 3, 1))
                .reshape(Co, 9 * Ci).astype(jnp.bfloat16))

    kparams = (
        conv_w(w1_t), b1_t.reshape(C, 1),
        conv_w(w2_t), b2_t.reshape(C, 1),
        wd_t[:, :, 1, 1], bd_t.reshape(4, 1),   # 3x3 on a 1x1 map == center tap
        wu_t[:, :, 1, 1], bu_t.reshape(C, 1),
    )

    out = rcab_pallas(x, kparams)
    out = jax.block_until_ready(out)

    ref = rcab_ref(x, (w1_t, b1_t, w2_t, b2_t, wd_t, bd_t, wu_t, bu_t))
    err = float(jnp.max(jnp.abs(out - ref)))
    # bf16 MXU operands (f32 accumulation) -> loosened tolerance vs pure f32.
    assert jnp.allclose(out, ref, atol=5e-2, rtol=5e-2), f"max abs err {err}"
    print("KERNEL_OK")
</pallas_src>

<mosaic_0001>
module attributes {stable_mosaic.version = 11 : i64} {
  func.func @rcab_kernel(%arg0: i32, %arg1: memref<1x16x256xf32, #tpu.memory_space<vmem>>, %arg2: memref<9x256xf32, #tpu.memory_space<vmem>>, %arg3: memref<16x144xbf16, #tpu.memory_space<vmem>>, %arg4: memref<16x1xf32, #tpu.memory_space<vmem>>, %arg5: memref<16x144xbf16, #tpu.memory_space<vmem>>, %arg6: memref<16x1xf32, #tpu.memory_space<vmem>>, %arg7: memref<4x16xf32, #tpu.memory_space<vmem>>, %arg8: memref<4x1xf32, #tpu.memory_space<vmem>>, %arg9: memref<16x4xf32, #tpu.memory_space<vmem>>, %arg10: memref<16x1xf32, #tpu.memory_space<vmem>>, %arg11: memref<1x16x256xf32, #tpu.memory_space<vmem>>) attributes {dimension_semantics = [#tpu.dimension_semantics<parallel>], iteration_bounds = array<i64: 2>, scalar_prefetch = 0 : i64, scratch_operands = 0 : i64, tpu.core_type = #tpu.core_type<tc>, window_params = [{transform_indices = @transform_0, window_bounds = array<i64: 1, 16, 256>}, {pipeline_mode = #tpu.pipeline_mode<synchronous>, transform_indices = @transform_1, window_bounds = array<i64: 9, 256>}, {pipeline_mode = #tpu.pipeline_mode<synchronous>, transform_indices = @transform_2, window_bounds = array<i64: 16, 144>}, {pipeline_mode = #tpu.pipeline_mode<synchronous>, transform_indices = @transform_3, window_bounds = array<i64: 16, 1>}, {pipeline_mode = #tpu.pipeline_mode<synchronous>, transform_indices = @transform_4, window_bounds = array<i64: 16, 144>}, {pipeline_mode = #tpu.pipeline_mode<synchronous>, transform_indices = @transform_5, window_bounds = array<i64: 16, 1>}, {pipeline_mode = #tpu.pipeline_mode<synchronous>, transform_indices = @transform_6, window_bounds = array<i64: 4, 16>}, {pipeline_mode = #tpu.pipeline_mode<synchronous>, transform_indices = @transform_7, window_bounds = array<i64: 4, 1>}, {pipeline_mode = #tpu.pipeline_mode<synchronous>, transform_indices = @transform_8, window_bounds = array<i64: 16, 4>}, {pipeline_mode = #tpu.pipeline_mode<synchronous>, transform_indices = @transform_9, window_bounds = array<i64: 16, 1>}, {transform_indices = @transform_10, window_bounds = array<i64: 1, 16, 256>}]} {
    %c0 = arith.constant 0 : index
    %c0_0 = arith.constant 0 : index
    %c0_1 = arith.constant 0 : index
    %0 = vector.load %arg1[%c0, %c0_0, %c0_1] : memref<1x16x256xf32, #tpu.memory_space<vmem>>, vector<1x16x256xf32>
    %1 = vector.shape_cast %0 : vector<1x16x256xf32> to vector<16x256xf32>
    %c0_2 = arith.constant 0 : index
    %c0_3 = arith.constant 0 : index
    %2 = vector.load %arg3[%c0_2, %c0_3] : memref<16x144xbf16, #tpu.memory_space<vmem>>, vector<16x144xbf16>
    %c17_i32 = arith.constant 17 : i32
    %3 = tpu.dynamic_rotate %1 by %c17_i32 dim 1 : vector<16x256xf32>, i32 -> vector<16x256xf32>
    %c0_4 = arith.constant 0 : index
    %c0_5 = arith.constant 0 : index
    %4 = vector.load %arg2[%c0_4, %c0_5] : memref<9x256xf32, #tpu.memory_space<vmem>>, vector<1x256xf32>
    %5 = vector.broadcast %4 : vector<1x256xf32> to vector<16x256xf32>
    %6 = arith.mulf %3, %5 : vector<16x256xf32>
    %c16_i32 = arith.constant 16 : i32
    %7 = tpu.dynamic_rotate %1 by %c16_i32 dim 1 : vector<16x256xf32>, i32 -> vector<16x256xf32>
    %c1 = arith.constant 1 : index
    %c0_6 = arith.constant 0 : index
    %8 = vector.load %arg2[%c1, %c0_6] : memref<9x256xf32, #tpu.memory_space<vmem>>, vector<1x256xf32>
    %9 = vector.broadcast %8 : vector<1x256xf32> to vector<16x256xf32>
    %10 = arith.mulf %7, %9 : vector<16x256xf32>
    %c15_i32 = arith.constant 15 : i32
    %11 = tpu.dynamic_rotate %1 by %c15_i32 dim 1 : vector<16x256xf32>, i32 -> vector<16x256xf32>
    %c2 = arith.constant 2 : index
    %c0_7 = arith.constant 0 : index
    %12 = vector.load %arg2[%c2, %c0_7] : memref<9x256xf32, #tpu.memory_space<vmem>>, vector<1x256xf32>
    %13 = vector.broadcast %12 : vector<1x256xf32> to vector<16x256xf32>
    %14 = arith.mulf %11, %13 : vector<16x256xf32>
    %c1_i32 = arith.constant 1 : i32
    %15 = tpu.dynamic_rotate %1 by %c1_i32 dim 1 : vector<16x256xf32>, i32 -> vector<16x256xf32>
    %c3 = arith.constant 3 : index
    %c0_8 = arith.constant 0 : index
    %16 = vector.load %arg2[%c3, %c0_8] : memref<9x256xf32, #tpu.memory_space<vmem>>, vector<1x256xf32>
    %17 = vector.broadcast %16 : vector<1x256xf32> to vector<16x256xf32>
    %18 = arith.mulf %15, %17 : vector<16x256xf32>
    %c255_i32 = arith.constant 255 : i32
    %19 = tpu.dynamic_rotate %1 by %c255_i32 dim 1 : vector<16x256xf32>, i32 -> vector<16x256xf32>
    %c5 = arith.constant 5 : index
    %c0_9 = arith.constant 0 : index
    %20 = vector.load %arg2[%c5, %c0_9] : memref<9x256xf32, #tpu.memory_space<vmem>>, vector<1x256xf32>
    %21 = vector.broadcast %20 : vector<1x256xf32> to vector<16x256xf32>
    %22 = arith.mulf %19, %21 : vector<16x256xf32>
    %c241_i32 = arith.constant 241 : i32
    %23 = tpu.dynamic_rotate %1 by %c241_i32 dim 1 : vector<16x256xf32>, i32 -> vector<16x256xf32>
    %c6 = arith.constant 6 : index
    %c0_10 = arith.constant 0 : index
    %24 = vector.load %arg2[%c6, %c0_10] : memref<9x256xf32, #tpu.memory_space<vmem>>, vector<1x256xf32>
    %25 = vector.broadcast %24 : vector<1x256xf32> to vector<16x256xf32>
    %26 = arith.mulf %23, %25 : vector<16x256xf32>
    %c240_i32 = arith.constant 240 : i32
    %27 = tpu.dynamic_rotate %1 by %c240_i32 dim 1 : vector<16x256xf32>, i32 -> vector<16x256xf32>
    %c7 = arith.constant 7 : index
    %c0_11 = arith.constant 0 : index
    %28 = vector.load %arg2[%c7, %c0_11] : memref<9x256xf32, #tpu.memory_space<vmem>>, vector<1x256xf32>
    %29 = vector.broadcast %28 : vector<1x256xf32> to vector<16x256xf32>
    %30 = arith.mulf %27, %29 : vector<16x256xf32>
    %c239_i32 = arith.constant 239 : i32
    %31 = tpu.dynamic_rotate %1 by %c239_i32 dim 1 : vector<16x256xf32>, i32 -> vector<16x256xf32>
    %c8 = arith.constant 8 : index
    %c0_12 = arith.constant 0 : index
    %32 = vector.load %arg2[%c8, %c0_12] : memref<9x256xf32, #tpu.memory_space<vmem>>, vector<1x256xf32>
    %33 = vector.broadcast %32 : vector<1x256xf32> to vector<16x256xf32>
    %34 = arith.mulf %31, %33 : vector<16x256xf32>
    %35 = tpu.concatenate %6, %10, %14, %18, %1, %22, %26, %30, %34 in 0 : vector<16x256xf32>, vector<16x256xf32>, vector<16x256xf32>, vector<16x256xf32>, vector<16x256xf32>, vector<16x256xf32>, vector<16x256xf32>, vector<16x256xf32>, vector<16x256xf32> -> vector<144x256xf32>
    %36 = arith.truncf %35 : vector<144x256xf32> to vector<144x256xbf16>
    %cst = arith.constant dense<0.000000e+00> : vector<16x256xf32>
    %37 = tpu.matmul %2, %36, %cst {dimension_numbers = #tpu.dot_dimension_numbers<[1], [0], [0], [1], [0, 0, 1, 1], [], []>} : vector<16x144xbf16>, vector<144x256xbf16>, vector<16x256xf32> -> vector<16x256xf32>
    %c0_13 = arith.constant 0 : index
    %c0_14 = arith.constant 0 : index
    %38 = vector.load %arg4[%c0_13, %c0_14] : memref<16x1xf32, #tpu.memory_space<vmem>>, vector<16x1xf32>
    %39 = vector.broadcast %38 : vector<16x1xf32> to vector<16x256xf32>
    %40 = arith.addf %37, %39 : vector<16x256xf32>
    %cst_15 = arith.constant 0.000000e+00 : f32
    %41 = vector.broadcast %cst_15 : f32 to vector<16x256xf32>
    %42 = arith.maximumf %40, %41 : vector<16x256xf32>
    %c0_16 = arith.constant 0 : index
    %c0_17 = arith.constant 0 : index
    %43 = vector.load %arg5[%c0_16, %c0_17] : memref<16x144xbf16, #tpu.memory_space<vmem>>, vector<16x144xbf16>
    %c17_i32_18 = arith.constant 17 : i32
    %44 = tpu.dynamic_rotate %42 by %c17_i32_18 dim 1 : vector<16x256xf32>, i32 -> vector<16x256xf32>
    %c0_19 = arith.constant 0 : index
    %c0_20 = arith.constant 0 : index
    %45 = vector.load %arg2[%c0_19, %c0_20] : memref<9x256xf32, #tpu.memory_space<vmem>>, vector<1x256xf32>
    %46 = vector.broadcast %45 : vector<1x256xf32> to vector<16x256xf32>
    %47 = arith.mulf %44, %46 : vector<16x256xf32>
    %c16_i32_21 = arith.constant 16 : i32
    %48 = tpu.dynamic_rotate %42 by %c16_i32_21 dim 1 : vector<16x256xf32>, i32 -> vector<16x256xf32>
    %c1_22 = arith.constant 1 : index
    %c0_23 = arith.constant 0 : index
    %49 = vector.load %arg2[%c1_22, %c0_23] : memref<9x256xf32, #tpu.memory_space<vmem>>, vector<1x256xf32>
    %50 = vector.broadcast %49 : vector<1x256xf32> to vector<16x256xf32>
    %51 = arith.mulf %48, %50 : vector<16x256xf32>
    %c15_i32_24 = arith.constant 15 : i32
    %52 = tpu.dynamic_rotate %42 by %c15_i32_24 dim 1 : vector<16x256xf32>, i32 -> vector<16x256xf32>
    %c2_25 = arith.constant 2 : index
    %c0_26 = arith.constant 0 : index
    %53 = vector.load %arg2[%c2_25, %c0_26] : memref<9x256xf32, #tpu.memory_space<vmem>>, vector<1x256xf32>
    %54 = vector.broadcast %53 : vector<1x256xf32> to vector<16x256xf32>
    %55 = arith.mulf %52, %54 : vector<16x256xf32>
    %c1_i32_27 = arith.constant 1 : i32
    %56 = tpu.dynamic_rotate %42 by %c1_i32_27 dim 1 : vector<16x256xf32>, i32 -> vector<16x256xf32>
    %c3_28 = arith.constant 3 : index
    %c0_29 = arith.constant 0 : index
    %57 = vector.load %arg2[%c3_28, %c0_29] : memref<9x256xf32, #tpu.memory_space<vmem>>, vector<1x256xf32>
    %58 = vector.broadcast %57 : vector<1x256xf32> to vector<16x256xf32>
    %59 = arith.mulf %56, %58 : vector<16x256xf32>
    %c255_i32_30 = arith.constant 255 : i32
    %60 = tpu.dynamic_rotate %42 by %c255_i32_30 dim 1 : vector<16x256xf32>, i32 -> vector<16x256xf32>
    %c5_31 = arith.constant 5 : index
    %c0_32 = arith.constant 0 : index
    %61 = vector.load %arg2[%c5_31, %c0_32] : memref<9x256xf32, #tpu.memory_space<vmem>>, vector<1x256xf32>
    %62 = vector.broadcast %61 : vector<1x256xf32> to vector<16x256xf32>
    %63 = arith.mulf %60, %62 : vector<16x256xf32>
    %c241_i32_33 = arith.constant 241 : i32
    %64 = tpu.dynamic_rotate %42 by %c241_i32_33 dim 1 : vector<16x256xf32>, i32 -> vector<16x256xf32>
    %c6_34 = arith.constant 6 : index
    %c0_35 = arith.constant 0 : index
    %65 = vector.load %arg2[%c6_34, %c0_35] : memref<9x256xf32, #tpu.memory_space<vmem>>, vector<1x256xf32>
    %66 = vector.broadcast %65 : vector<1x256xf32> to vector<16x256xf32>
    %67 = arith.mulf %64, %66 : vector<16x256xf32>
    %c240_i32_36 = arith.constant 240 : i32
    %68 = tpu.dynamic_rotate %42 by %c240_i32_36 dim 1 : vector<16x256xf32>, i32 -> vector<16x256xf32>
    %c7_37 = arith.constant 7 : index
    %c0_38 = arith.constant 0 : index
    %69 = vector.load %arg2[%c7_37, %c0_38] : memref<9x256xf32, #tpu.memory_space<vmem>>, vector<1x256xf32>
    %70 = vector.broadcast %69 : vector<1x256xf32> to vector<16x256xf32>
    %71 = arith.mulf %68, %70 : vector<16x256xf32>
    %c239_i32_39 = arith.constant 239 : i32
    %72 = tpu.dynamic_rotate %42 by %c239_i32_39 dim 1 : vector<16x256xf32>, i32 -> vector<16x256xf32>
    %c8_40 = arith.constant 8 : index
    %c0_41 = arith.constant 0 : index
    %73 = vector.load %arg2[%c8_40, %c0_41] : memref<9x256xf32, #tpu.memory_space<vmem>>, vector<1x256xf32>
    %74 = vector.broadcast %73 : vector<1x256xf32> to vector<16x256xf32>
    %75 = arith.mulf %72, %74 : vector<16x256xf32>
    %76 = tpu.concatenate %47, %51, %55, %59, %42, %63, %67, %71, %75 in 0 : vector<16x256xf32>, vector<16x256xf32>, vector<16x256xf32>, vector<16x256xf32>, vector<16x256xf32>, vector<16x256xf32>, vector<16x256xf32>, vector<16x256xf32>, vector<16x256xf32> -> vector<144x256xf32>
    %77 = arith.truncf %76 : vector<144x256xf32> to vector<144x256xbf16>
    %cst_42 = arith.constant dense<0.000000e+00> : vector<16x256xf32>
    %78 = tpu.matmul %43, %77, %cst_42 {dimension_numbers = #tpu.dot_dimension_numbers<[1], [0], [0], [1], [0, 0, 1, 1], [], []>} : vector<16x144xbf16>, vector<144x256xbf16>, vector<16x256xf32> -> vector<16x256xf32>
    %c0_43 = arith.constant 0 : index
    %c0_44 = arith.constant 0 : index
    %79 = vector.load %arg6[%c0_43, %c0_44] : memref<16x1xf32, #tpu.memory_space<vmem>>, vector<16x1xf32>
    %80 = vector.broadcast %79 : vector<16x1xf32> to vector<16x256xf32>
    %81 = arith.addf %78, %80 : vector<16x256xf32>
    %c0_45 = arith.constant 0 : index
    %c0_46 = arith.constant 0 : index
    %82 = vector.load %arg7[%c0_45, %c0_46] : memref<4x16xf32, #tpu.memory_space<vmem>>, vector<4x16xf32>
    %cst_47 = arith.constant dense<0.000000e+00> : vector<4x256xf32>
    %83 = tpu.matmul %82, %81, %cst_47 {dimension_numbers = #tpu.dot_dimension_numbers<[1], [0], [0], [1], [0, 0, 1, 1], [], []>} : vector<4x16xf32>, vector<16x256xf32>, vector<4x256xf32> -> vector<4x256xf32>
    %cst_48 = arith.constant dense<0.000000e+00> : vector<4xf32>
    %84 = vector.multi_reduction <add>, %83, %cst_48 [1] : vector<4x256xf32> to vector<4xf32>
    %85 = vector.shape_cast %84 : vector<4xf32> to vector<4x1xf32>
    %cst_49 = arith.constant 2.560000e+02 : f32
    %86 = vector.broadcast %cst_49 : f32 to vector<4x1xf32>
    %87 = arith.divf %85, %86 : vector<4x1xf32>
    %c0_50 = arith.constant 0 : index
    %c0_51 = arith.constant 0 : index
    %88 = vector.load %arg8[%c0_50, %c0_51] : memref<4x1xf32, #tpu.memory_space<vmem>>, vector<4x1xf32>
    %89 = arith.addf %87, %88 : vector<4x1xf32>
    %cst_52 = arith.constant 0.000000e+00 : f32
    %90 = vector.broadcast %cst_52 : f32 to vector<4x1xf32>
    %91 = arith.maximumf %89, %90 : vector<4x1xf32>
    %c0_53 = arith.constant 0 : index
    %c0_54 = arith.constant 0 : index
    %92 = vector.load %arg9[%c0_53, %c0_54] : memref<16x4xf32, #tpu.memory_space<vmem>>, vector<16x4xf32>
    %93 = vector.shape_cast %91 : vector<4x1xf32> to vector<4x1xf32>
    %94 = vector.broadcast %93 : vector<4x1xf32> to vector<4x256xf32>
    %cst_55 = arith.constant dense<0.000000e+00> : vector<16x256xf32>
    %95 = tpu.matmul %92, %94, %cst_55 {dimension_numbers = #tpu.dot_dimension_numbers<[1], [0], [0], [1], [0, 0, 1, 1], [], []>} : vector<16x4xf32>, vector<4x256xf32>, vector<16x256xf32> -> vector<16x256xf32>
    %c0_56 = arith.constant 0 : index
    %c0_57 = arith.constant 0 : index
    %96 = vector.load %arg10[%c0_56, %c0_57] : memref<16x1xf32, #tpu.memory_space<vmem>>, vector<16x1xf32>
    %97 = vector.broadcast %96 : vector<16x1xf32> to vector<16x256xf32>
    %98 = arith.addf %95, %97 : vector<16x256xf32>
    %cst_58 = arith.constant 0.000000e+00 : f32
    %99 = vector.broadcast %cst_58 : f32 to vector<16x256xf32>
    %100 = arith.subf %99, %98 : vector<16x256xf32>
    %101 = math.exp %100 : vector<16x256xf32>
    %cst_59 = arith.constant 1.000000e+00 : f32
    %102 = vector.broadcast %cst_59 : f32 to vector<16x256xf32>
    %103 = arith.addf %102, %101 : vector<16x256xf32>
    %104 = tpu.reciprocal %103 {approx = true} : vector<16x256xf32> -> vector<16x256xf32>
    %105 = arith.mulf %81, %104 : vector<16x256xf32>
    %106 = arith.addf %1, %105 : vector<16x256xf32>
    %c0_60 = arith.constant 0 : index
    %c0_61 = arith.constant 0 : index
    %c0_62 = arith.constant 0 : index
    %107 = vector.load %arg11[%c0_60, %c0_61, %c0_62] : memref<1x16x256xf32, #tpu.memory_space<vmem>>, vector<1x16x256xf32>
    %108 = vector.shape_cast %107 : vector<1x16x256xf32> to vector<16x256xf32>
    %109 = vector.shape_cast %106 : vector<16x256xf32> to vector<1x16x256xf32>
    tpu.vector_store %arg11[%c0_60, %c0_61, %c0_62], %109 {strides = array<i32>} : memref<1x16x256xf32, #tpu.memory_space<vmem>>, vector<1x16x256xf32>,
    return
  }
  func.func @transform_0(%arg0: i32) -> (i32, i32, i32) {
    %c0_i32 = arith.constant 0 : i32
    %c0_i32_0 = arith.constant 0 : i32
    %c0_i32_1 = arith.constant 0 : i32
    return %arg0, %c0_i32, %c0_i32_0 : i32, i32, i32
  }
  func.func @transform_1(%arg0: i32) -> (i32, i32) {
    %c0_i32 = arith.constant 0 : i32
    %c0_i32_0 = arith.constant 0 : i32
    %c0_i32_1 = arith.constant 0 : i32
    return %c0_i32, %c0_i32_0 : i32, i32
  }
  func.func @transform_2(%arg0: i32) -> (i32, i32) {
    %c0_i32 = arith.constant 0 : i32
    %c0_i32_0 = arith.constant 0 : i32
    %c0_i32_1 = arith.constant 0 : i32
    return %c0_i32, %c0_i32_0 : i32, i32
  }
  func.func @transform_3(%arg0: i32) -> (i32, i32) {
    %c0_i32 = arith.constant 0 : i32
    %c0_i32_0 = arith.constant 0 : i32
    %c0_i32_1 = arith.constant 0 : i32
    return %c0_i32, %c0_i32_0 : i32, i32
  }
  func.func @transform_4(%arg0: i32) -> (i32, i32) {
    %c0_i32 = arith.constant 0 : i32
    %c0_i32_0 = arith.constant 0 : i32
    %c0_i32_1 = arith.constant 0 : i32
    return %c0_i32, %c0_i32_0 : i32, i32
  }
  func.func @transform_5(%arg0: i32) -> (i32, i32) {
    %c0_i32 = arith.constant 0 : i32
    %c0_i32_0 = arith.constant 0 : i32
    %c0_i32_1 = arith.constant 0 : i32
    return %c0_i32, %c0_i32_0 : i32, i32
  }
  func.func @transform_6(%arg0: i32) -> (i32, i32) {
    %c0_i32 = arith.constant 0 : i32
    %c0_i32_0 = arith.constant 0 : i32
    %c0_i32_1 = arith.constant 0 : i32
    return %c0_i32, %c0_i32_0 : i32, i32
  }
  func.func @transform_7(%arg0: i32) -> (i32, i32) {
    %c0_i32 = arith.constant 0 : i32
    %c0_i32_0 = arith.constant 0 : i32
    %c0_i32_1 = arith.constant 0 : i32
    return %c0_i32, %c0_i32_0 : i32, i32
  }
  func.func @transform_8(%arg0: i32) -> (i32, i32) {
    %c0_i32 = arith.constant 0 : i32
    %c0_i32_0 = arith.constant 0 : i32
    %c0_i32_1 = arith.constant 0 : i32
    return %c0_i32, %c0_i32_0 : i32, i32
  }
  func.func @transform_9(%arg0: i32) -> (i32, i32) {
    %c0_i32 = arith.constant 0 : i32
    %c0_i32_0 = arith.constant 0 : i32
    %c0_i32_1 = arith.constant 0 : i32
    return %c0_i32, %c0_i32_0 : i32, i32
  }
  func.func @transform_10(%arg0: i32) -> (i32, i32, i32) {
    %c0_i32 = arith.constant 0 : i32
    %c0_i32_0 = arith.constant 0 : i32
    %c0_i32_1 = arith.constant 0 : i32
    return %arg0, %c0_i32, %c0_i32_0 : i32, i32, i32
  }
}

</mosaic_0001>

<bundles_post_ra>
// kernel: tpu_custom_call.1
= control target key start
LH: loop header
LB: loop body
LE: loop exit
PB: predicated region body
PF: predicated region fallthrough
CT: control target
= control target key end

     0   :  { %15 = vsyncpa [#allocation3], 0  ;;  %s2300_s0 = inlined_call_operand.vmem [shape: f32[2,16,256], index: 0, kind: input, shape index: {}]   ;;  %s2301_s1 = inlined_call_operand.hbm [shape: f32[9,256], index: 1, kind: input, shape index: {}]   ;;  %s2302_s2 = inlined_call_operand.hbm [shape: bf16[16,144], index: 2, kind: input, shape index: {}]   ;;  %s2303_s3 = inlined_call_operand.vmem [shape: f32[16,1], index: 3, kind: input, shape index: {}]   ;;  %s2304_s4 = inlined_call_operand.vmem [shape: bf16[16,144], index: 4, kind: input, shape index: {}]   ;;  %s2305_s5 = inlined_call_operand.vmem [shape: f32[16,1], index: 5, kind: input, shape index: {}]   ;;  %s2306_s6 = inlined_call_operand.hbm [shape: f32[4,16], index: 6, kind: input, shape index: {}]   ;;  %s2307_s7 = inlined_call_operand.vmem [shape: f32[4,1], index: 7, kind: input, shape index: {}]   ;;  %s2308_s8 = inlined_call_operand.vmem [shape: f32[16,4], index: 8, kind: input, shape index: {}]   ;;  %s2309_s9 = inlined_call_operand.vmem [shape: f32[16,1], index: 9, kind: input, shape index: {}]   ;;  %s2310_s10 = inlined_call_operand.hbm [shape: f32[2,16,256], index: 10, kind: output, shape index: {}]  }
   0x1   :  { %16 = vsyncpa [#allocation6], 0 }
   0x2   :  { %17 = vsyncpa [#allocation4], 0 }
   0x3   :  { %19 = vsyncpa [#allocation4 + $0x1], 0  ;;  %s1644_s13 = smov 0   ;;  %s1646_s14 = smov 0  }
   0x4   :  { %s1648_s15 = smov 0   ;;  %s1650_s16 = smov 0  }
   0x5 LB: > { %2313 = sst [smem:[#allocation12_spill]] %s1564_s15  ;;  %s1665_s17 = sadd.s32 4294967295, %s1568_s16   ;;  %s1568_s16 = sphi %s1650_s16, %s2328_s16   ;;  %s1564_s15 = sphi %s1648_s15, %s2325_s15   ;;  %s1560_s14 = sphi %s1646_s14, %s2327_s14   ;;  %s1556_s13 = sphi %s1644_s13, %s2326_s13  }
   0x6   : > { %s1282_s18 = sadd.s32 4294967294, %s1568_s16   ;;  %s1669_s19 = sadd.s32 1, %s1568_s16  }
   0x7   : > { %s247_s20 = sadd.s32 1, %s1564_s15  ;;  %s244_s21 = ssub.s32 %s1568_s16, %s1669_s19 }
   0x8   : > { %p257_p0 = scmp.ne.s32.totalorder %s1564_s15, %s1560_s14  ;;  %p245_p1 = scmp.eq.s32.totalorder %s244_s21, 0 }
   0x9   : > { %p258_p2 = scmp.eq.s32.totalorder %s1665_s17, 1  ;;  %p263_p3 = scmp.ne.s32.totalorder %s1560_s14, %s1556_s13 }
   0xa   : > { %p264_p4 = scmp.eq.s32.totalorder %s1282_s18, 1  ;;  %p1283_p7 = scmp.ge.s32.totalorder %s1568_s16, 1 }
   0xb   : > { %s1680_s22 = scalar_select %p245_p1, %s1564_s15, %s247_s20  }
   0xc   : > { %p1682_p5 = por %p258_p2, %p257_p0  ;;  %p1686_p6 = por %p264_p4, %p263_p3 }
   0xd   : > { %2314 = sst [smem:[#allocation13_spill]] %s1680_s22  ;;  %p271_p8 = scmp.lt.s32.totalorder %s1568_s16, 3 }
   0xe   : > { %s2316_s24 = scalar_select %p1686_p6, 1, 0 }
   0xf   : > { %p2311_p9 = scmp.eq.s32.totalorder %s1665_s17, 0  ;;  %p1693_p10 = pnand %p1283_p7, %p271_p8 }
  0x10   : > { %s1570_s26 = smov [#allocation5]   ;;  %s1571_s29 = smov [#allocation2]  }
  0x11   : > { %s296_s27 = sshll.u32 %s1570_s26, 4  ;;  %p1327_p11 = pneg %p1693_p10  ;;  %s297_s27 = int_to_ptr.vmem [resolvable:$true] %s296_s27 }
  0x12   : > { %s283_s30 = sshll.u32 %s1571_s29, 4  ;;  %s1433_s11 = scalar_lea.vmem %s297_s27, 256  ;;  %s284_s30 = int_to_ptr.vmem [resolvable:$true] %s283_s30 }
  0x13   : > { %p1701_p12 = pnand %p2311_p9, %p1327_p11  ;;  %p1434_p0 = scmp.ne.s32.totalorder %s297_s27, %s1433_s11 }
  0x14   : > { %p1441_p3 = scmp.lt.s32.totalorder %s297_s27, %s297_s27  ;;  %p1442_p4 = scmp.lt.s32.totalorder %s1433_s11, %s1433_s11 }
  0x15   : > { %p1424_p13 = pneg %p1701_p12 }
  0x16   : > { %p1443_p7 = por %p1442_p4, %p1441_p3 }
  0x17   : > { %p1436_p1 = pnand %p1434_p0, %p1424_p13 }
  0x19   : > { %p1437_p2 = pneg %p1436_p1 }
  0x1b   : > { %p1444_p8 = pnand %p1443_p7, %p1437_p2 }
  0x1d   : > { %1447 = shalt.err (!%p1444_p8)
}
  0x1e   : > { %s1572_s12 = smov 128   ;;  %s1573_s18 = smov 8  }
  0x1f   : > { %1333 = dma.hbm_to_vmem [thread:$0]  (!%p1701_p12), %s2302_s2, 256, %s297_s27, [#allocation6], %s1572_s12, %s1572_s12, %s1573_s18  }
  0x20   : > { %s1459_s26 = scalar_lea.vmem %s284_s30, 512  ;;  %p1467_p9 = scmp.lt.s32.totalorder %s284_s30, %s284_s30 }
  0x21   : > { %p1460_p11 = scmp.ne.s32.totalorder %s284_s30, %s1459_s26  ;;  %p1468_p6 = scmp.lt.s32.totalorder %s1459_s26, %s1459_s26 }
  0x23   : > { %p1462_p0 = pnand %p1460_p11, %p1424_p13  ;;  %p1469_p3 = por %p1468_p6, %p1467_p9 }
  0x25   : > { %p1463_p1 = pneg %p1462_p0 }
  0x27   : > { %p1470_p2 = pnand %p1469_p3, %p1463_p1 }
  0x29   : > { %1473 = shalt.err (!%p1470_p2)
}
  0x2a   : > { %s1574_s29 = smov 256   ;;  %s1575_s11 = smov 16  }
  0x2b   : > { %1330 = dma.hbm_to_vmem [thread:$0]  (!%p1701_p12), %s2301_s1, 512, %s284_s30, [#allocation3], %s1574_s29, %s1574_s29, %s1575_s11  }
  0x2c   : > { %s1576_s27 = smov [#allocation7]  }
  0x2d   : > { %s319_s12 = sshll.u32 %s1576_s27, 4  ;;  %s320_s12 = int_to_ptr.vmem [resolvable:$true] %s319_s12 }
  0x2e   : > { %s1485_s18 = scalar_lea.vmem %s320_s12, 64  ;;  %p1493_p9 = scmp.lt.s32.totalorder %s320_s12, %s320_s12 }
  0x2f   : > { %p1486_p4 = scmp.ne.s32.totalorder %s320_s12, %s1485_s18  ;;  %p1494_p8 = scmp.lt.s32.totalorder %s1485_s18, %s1485_s18 }
  0x31   : > { %p1488_p7 = pnand %p1486_p4, %p1424_p13  ;;  %p1495_p11 = por %p1494_p8, %p1493_p9 }
  0x33   : > { %p1489_p6 = pneg %p1488_p7 }
  0x35   : > { %p1496_p0 = pnand %p1495_p11, %p1489_p6 }
  0x37   : > { %1499 = shalt.err (!%p1496_p0)
}
  0x38   : > { %1336 = dma.hbm_to_vmem [thread:$0]  (!%p1701_p12), %s2306_s6, 64, %s320_s12, [#allocation6]  }
  0x39   : > { %349 = sbr.rel (%p1693_p10) target bundleno = 1568 (0x620), region = 60  ;;  %p2319_p1 = scmp.eq.s32.totalorder (!%p1693_p10), %s1665_s17, 0 }
  0x3e   : > { %1543 = dma.done.wait (%p2319_p1), [#allocation3], 512   ;;  %p2320_p13 = pmov %p2319_p1 }
  0x3f   : > { %p2321_p3 = pmov %p2319_p1 }
  0x40   : > { %1545 = vsyncadd (%p2320_p13), [#allocation3], 4294966784 }
  0x41   : > { %1547 = dma.done.wait (%p2321_p3), [#allocation6], 320   ;;  %p2322_p2 = pmov %p2319_p1 }
  0x42   : > { %p395_p4 = scmp.lt.s32.totalorder %s1665_s17, 1  ;;  %s1577_s26 = smov 112   ;;  %v1402_v4 = vld [vmem:[#allocation5 + $0x4] ss:$8 sps:$4 sm:$0xff]   ;;  %vm687_vm0 = vcmask 130048   ;;  %v1585_v5 = vmov 0   ;;  %v415_v8 = vlaneseq }
  0x43   : > { %1549 = vsyncadd (%p2322_p2), [#allocation6], 4294966976  ;;  %s1578_s29 = smov 113   ;;  %s1579_s11 = smov 127   ;;  %1297 = vmatprep.mubr.msk.bf16.mxu0 %vm687_vm0, %v1402_v4  ;;  %1398 = vset.pattern.permute.xlu0 %v1585_v5  ;;  %v666_v6 = vld [vmem:[%s2303_s3] sm:$0xff]  ;;  %v667_v7 = vld [vmem:[%s2303_s3 + $0x8] sm:$0xff] }
  0x44   : > { %s396_s15 = scalar_select %p395_p4, %s1665_s17, 1  ;;  %1399 = vset.pattern.permute.xlu1 %v1585_v5  ;;  %v425_v9 = vshrl.u32 %v415_v8, 7  ;;  %v1825_v10 = vand.u32 127, %v415_v8  ;;  %v602_v13 = vld [vmem:[#allocation2 + $0x7] ss:$8 sm:$0x3] }
  0x45   : > { %s1580_s27 = smov 1   ;;  %s1581_s12 = smov 15   ;;  %v572_v28 = vld [vmem:[#allocation2 + $0x6] ss:$8 sm:$0x3]  ;;  %vm1028_vm9 = vcmask 1043456  }
  0x46   : > { %s1311_s22 = sshll.u32 %s396_s15, 5  ;;  %s1582_s18 = smov 16   ;;  %v1827_v11 = vsub.s32 0, %v425_v9  ;;  %v1829_v12 = vsub.s32 1, %v425_v9  ;;  %vm596_vm1 = vcmp.lt.s32.totalorder %v1825_v10, 112  ;;  %vm566_vm2 = vcmp.lt.s32.totalorder %v1825_v10, 113 }
  0x47   : > { %s399_s30 = scalar_lea.vmem %s2300_s0, %s1311_s22  ;;  %s1583_s20 = smov 17   ;;  %v542_v45 = vld [vmem:[#allocation2 + $0x5] ss:$8 sm:$0x3]  ;;  %vm536_vm3 = vcmp.lt.s32.totalorder %v1825_v10, 127  ;;  %vm506_vm4 = vcmp.lt.s32.totalorder %v1825_v10, 1 }
  0x48   : > { %v1746_v0 = vld [vmem:[%s399_s30 + $0x8] sm:$0xff]  ;;  %v1748_v1 = vld [vmem:[%s399_s30] sm:$0xff]  ;;  %v1754_v2 = vld [vmem:[%s399_s30 + $0x18] sm:$0xff]  ;;  %s1584_s21 = smov 111   ;;  %v1833_v16 = vrot.slane %v602_v13, %v1827_v11  ;;  %v1836_v17 = vrot.slane %v602_v13, %v1829_v12  ;;  %v1852_v33 = vrot.slane %v572_v28, %v1827_v11  ;;  %v1855_v34 = vrot.slane %v572_v28, %v1829_v12  ;;  %s1312_s22 = sshll.u32 %s1665_s17, 9 }
  0x49   : > { %592 = vrot.lane.b32.xlu1 %v1746_v0, %s1577_s26  ;;  %588 = vrot.lane.b32.xlu0 %v1748_v1, %s1577_s26  ;;  %v1756_v3 = vld [vmem:[%s399_s30 + $0x10] sm:$0xff]  ;;  %v1871_v50 = vrot.slane %v542_v45, %v1827_v11  ;;  %v1874_v51 = vrot.slane %v542_v45, %v1829_v12  ;;  %v512_v62 = vld [vmem:[#allocation2 + $0x3] ss:$8 sm:$0x3]  ;;  %vm476_vm5 = vcmp.lt.s32.totalorder %v1825_v10, 15  ;;  %vm446_vm6 = vcmp.lt.s32.totalorder %v1825_v10, 16 }
  0x4a   : > { %v1892_v8 = vrot.slane %v512_v62, %v1827_v11  ;;  %v1895_v9 = vrot.slane %v512_v62, %v1829_v12  ;;  %v656_v13 = vpack.c.bf16 %v1756_v3, %v1748_v1  ;;  %v452_v45 = vld [vmem:[#allocation2 + $0x1] ss:$8 sm:$0x3]  ;;  %vm417_vm7 = vcmp.lt.s32.totalorder %v1825_v10, 17 }
  0x4b   : > { %vm626_vm8 = vcmp.lt.s32.totalorder %v1825_v10, 111  ;;  %v1586_v10 = vmov 0.0   ;;  %vm1057_vm10 = vcmask 31744  }
  0x4d   : > { %594 = vrot.lane.b32.xlu1 %v1754_v2, %s1577_s26  ;;  %590 = vrot.lane.b32.xlu0 %v1756_v3, %s1577_s26 }
  0x51   : > { %560 = vrot.lane.b32.xlu1 %v1756_v3, %s1578_s29  ;;  %558 = vrot.lane.b32.xlu0 %v1748_v1, %s1578_s29 }
  0x55   : > { %564 = vrot.lane.b32.xlu1 %v1754_v2, %s1578_s29  ;;  %562 = vrot.lane.b32.xlu0 %v1746_v0, %s1578_s29 }
  0x59   : > { %530 = vrot.lane.b32.xlu1 %v1756_v3, %s1579_s11  ;;  %528 = vrot.lane.b32.xlu0 %v1748_v1, %s1579_s11 }
  0x5d   : > { %534 = vrot.lane.b32.xlu1 %v1754_v2, %s1579_s11  ;;  %532 = vrot.lane.b32.xlu0 %v1746_v0, %s1579_s11 }
  0x61   : > { %500 = vrot.lane.b32.xlu1 %v1756_v3, %s1580_s27  ;;  %498 = vrot.lane.b32.xlu0 %v1748_v1, %s1580_s27 }
  0x65   : > { %504 = vrot.lane.b32.xlu1 %v1754_v2, %s1580_s27  ;;  %502 = vrot.lane.b32.xlu0 %v1746_v0, %s1580_s27 }
  0x69   : > { %470 = vrot.lane.b32.xlu1 %v1756_v3, %s1581_s12  ;;  %468 = vrot.lane.b32.xlu0 %v1748_v1, %s1581_s12 }
  0x6d   : > { %474 = vrot.lane.b32.xlu1 %v1754_v2, %s1581_s12  ;;  %472 = vrot.lane.b32.xlu0 %v1746_v0, %s1581_s12 }
  0x71   : > { %440 = vrot.lane.b32.xlu1 %v1756_v3, %s1582_s18  ;;  %438 = vrot.lane.b32.xlu0 %v1748_v1, %s1582_s18 }
  0x75   : > { %444 = vrot.lane.b32.xlu1 %v1754_v2, %s1582_s18  ;;  %442 = vrot.lane.b32.xlu0 %v1746_v0, %s1582_s18 }
  0x79   : > { %409 = vrot.lane.b32.xlu1 %v1756_v3, %s1583_s20  ;;  %407 = vrot.lane.b32.xlu0 %v1748_v1, %s1583_s20 }
  0x7d   : > { %413 = vrot.lane.b32.xlu1 %v1754_v2, %s1583_s20  ;;  %411 = vrot.lane.b32.xlu0 %v1746_v0, %s1583_s20 }
  0x81   : > { %620 = vrot.lane.b32.xlu1 %v1756_v3, %s1584_s21  ;;  %618 = vrot.lane.b32.xlu0 %v1748_v1, %s1584_s21 }
  0x85   : > { %624 = vrot.lane.b32.xlu1 %v1754_v2, %s1584_s21  ;;  %622 = vrot.lane.b32.xlu0 %v1746_v0, %s1584_s21 }
  0x89   : > { %670 = vperm.xlu0 %1398, %v666_v6   ;;  %675 = vperm.xlu1 %1399, %v667_v7   ;;  %v657_v7 = vpack.c.bf16 %v1754_v2, %v1746_v0 }
  0xbb   : > { %v593_v14 = vpop.permute.xlu1 %592  ;;  %v589_v15 = vpop.permute.xlu0 %588 }
  0xbc   : > { %v597_v18 = vsel %vm596_vm1, %v589_v15, %v593_v14  ;;  %v599_v19 = vsel %vm596_vm1, %v593_v14, %v589_v15 }
  0xbd   : > { %v614_v24 = vmul.f32 %v1833_v16, %v597_v18  ;;  %v615_v26 = vmul.f32 %v1836_v17, %v599_v19 }
  0xbf   : > { %v595_v20 = vpop.permute.xlu1 %594  ;;  %v591_v21 = vpop.permute.xlu0 %590 }
  0xc0   : > { %v598_v22 = vsel %vm596_vm1, %v591_v21, %v595_v20  ;;  %v600_v23 = vsel %vm596_vm1, %v595_v20, %v591_v21 }
  0xc1   : > { %v616_v25 = vmul.f32 %v1833_v16, %v598_v22  ;;  %v617_v27 = vmul.f32 %v1836_v17, %v600_v23 }
  0xc3   : > { %v561_v29 = vpop.permute.xlu1 %560  ;;  %v559_v30 = vpop.permute.xlu0 %558  ;;  %v663_v31 = vpack.c.bf16 %v617_v27, %v615_v26  ;;  %v662_v32 = vpack.c.bf16 %v616_v25, %v614_v24  ;;  %v482_v26 = vld [vmem:[#allocation2 + $0x2] ss:$8 sm:$0x3] }
  0xc5   : > { %691 = vmatprep.subr.bf16.mxu0 %v663_v31  ;;  %v1913_v31 = vrot.slane %v482_v26, %v1827_v11 }
  0xc6   : > { %692 = vmatpush1.bf16.msra.mxu0 %v662_v32  ;;  %v1916_v32 = vrot.slane %v482_v26, %v1829_v12 }
  0xc7   : > { %v565_v35 = vpop.permute.xlu1 %564  ;;  %v563_v36 = vpop.permute.xlu0 %562 }
  0xc8   : > { %v568_v37 = vsel %vm566_vm2, %v561_v29, %v565_v35  ;;  %v570_v38 = vsel %vm566_vm2, %v565_v35, %v561_v29  ;;  %v567_v39 = vsel %vm566_vm2, %v559_v30, %v563_v36  ;;  %v569_v40 = vsel %vm566_vm2, %v563_v36, %v559_v30 }
  0xc9   : > { %v586_v41 = vmul.f32 %v1852_v33, %v568_v37  ;;  %v587_v42 = vmul.f32 %v1855_v34, %v570_v38  ;;  %v584_v43 = vmul.f32 %v1852_v33, %v567_v39  ;;  %v585_v44 = vmul.f32 %v1855_v34, %v569_v40 }
  0xcb   : > { %v531_v46 = vpop.permute.xlu1 %530  ;;  %v529_v47 = vpop.permute.xlu0 %528  ;;  %v661_v48 = vpack.c.bf16 %v587_v42, %v585_v44  ;;  %v660_v49 = vpack.c.bf16 %v586_v41, %v584_v43 }
  0xcd   : > { %693 = vmatprep.subr.bf16.mxu0 %v661_v48 }
  0xce   : > { %694 = vmatpush1.bf16.msra.mxu0 %v660_v49 }
  0xcf   : > { %v535_v52 = vpop.permute.xlu1 %534  ;;  %v533_v53 = vpop.permute.xlu0 %532 }
  0xd0   : > { %v538_v54 = vsel %vm536_vm3, %v531_v46, %v535_v52  ;;  %v540_v55 = vsel %vm536_vm3, %v535_v52, %v531_v46  ;;  %v537_v56 = vsel %vm536_vm3, %v529_v47, %v533_v53  ;;  %v539_v57 = vsel %vm536_vm3, %v533_v53, %v529_v47 }
  0xd1   : > { %v556_v58 = vmul.f32 %v1871_v50, %v538_v54  ;;  %v557_v59 = vmul.f32 %v1874_v51, %v540_v55  ;;  %v554_v60 = vmul.f32 %v1871_v50, %v537_v56  ;;  %v555_v61 = vmul.f32 %v1874_v51, %v539_v57 }
  0xd2   : > { %v1932_v52 = vrot.slane %v452_v45, %v1827_v11  ;;  %v1935_v53 = vrot.slane %v452_v45, %v1829_v12 }
  0xd3   : > { %v501_v63 = vpop.permute.xlu1 %500  ;;  %v499_v4 = vpop.permute.xlu0 %498  ;;  %v659_v5 = vpack.c.bf16 %v557_v59, %v555_v61  ;;  %v658_v6 = vpack.c.bf16 %v556_v58, %v554_v60 }
  0xd5   : > { %695 = vmatprep.subr.bf16.mxu0 %v659_v5 }
  0xd6   : > { %696 = vmatpush1.bf16.msra.mxu0 %v658_v6 }
  0xd7   : > { %v505_v14 = vpop.permute.xlu1 %504  ;;  %v503_v15 = vpop.permute.xlu0 %502  ;;  %697 = vmatprep.subr.bf16.mxu0 %v657_v7 }
  0xd8   : > { %v508_v18 = vsel %vm506_vm4, %v501_v63, %v505_v14  ;;  %v510_v19 = vsel %vm506_vm4, %v505_v14, %v501_v63  ;;  %v507_v20 = vsel %vm506_vm4, %v499_v4, %v503_v15  ;;  %v509_v21 = vsel %vm506_vm4, %v503_v15, %v499_v4  ;;  %v422_v4 = vld [vmem:[#allocation2] ss:$8 sm:$0x3] }
  0xd9   : > { %v526_v22 = vmul.f32 %v1892_v8, %v510_v19  ;;  %v527_v23 = vmul.f32 %v1895_v9, %v508_v18  ;;  %v524_v24 = vmul.f32 %v1892_v8, %v509_v21  ;;  %v525_v25 = vmul.f32 %v1895_v9, %v507_v20 }
  0xda   : > { %698 = vmatpush1.bf16.msra.mxu0 %v656_v13  ;;  %v1951_v14 = vrot.slane %v422_v4, %v1827_v11  ;;  %v1954_v15 = vrot.slane %v422_v4, %v1829_v12 }
  0xdb   : > { %v471_v27 = vpop.permute.xlu1 %470  ;;  %v469_v28 = vpop.permute.xlu0 %468  ;;  %v655_v29 = vpack.c.bf16 %v527_v23, %v525_v25  ;;  %v654_v30 = vpack.c.bf16 %v526_v22, %v524_v24 }
  0xdd   : > { %699 = vmatprep.subr.bf16.mxu0 %v655_v29 }
  0xde   : > { %700 = vmatpush1.bf16.msra.mxu0 %v654_v30 }
  0xdf   : > { %v475_v35 = vpop.permute.xlu1 %474  ;;  %v473_v36 = vpop.permute.xlu0 %472 }
  0xe0   : > { %v478_v37 = vsel %vm476_vm5, %v471_v27, %v475_v35  ;;  %v480_v38 = vsel %vm476_vm5, %v475_v35, %v471_v27  ;;  %v477_v39 = vsel %vm476_vm5, %v469_v28, %v473_v36  ;;  %v479_v40 = vsel %vm476_vm5, %v473_v36, %v469_v28  ;;  %v632_v28 = vld [vmem:[#allocation2 + $0x10] ss:$8 sm:$0x3] }
  0xe1   : > { %v496_v41 = vmul.f32 %v1913_v31, %v480_v38  ;;  %v497_v42 = vmul.f32 %v1916_v32, %v478_v37  ;;  %v494_v43 = vmul.f32 %v1913_v31, %v479_v40  ;;  %v495_v44 = vmul.f32 %v1916_v32, %v477_v39 }
  0xe2   : > { %v1970_v37 = vrot.slane %v632_v28, %v1827_v11  ;;  %v1973_v38 = vrot.slane %v632_v28, %v1829_v12 }
  0xe3   : > { %v441_v46 = vpop.permute.xlu1 %440  ;;  %v439_v47 = vpop.permute.xlu0 %438  ;;  %v653_v48 = vpack.c.bf16 %v497_v42, %v495_v44  ;;  %v652_v49 = vpack.c.bf16 %v496_v41, %v494_v43 }
  0xe5   : > { %701 = vmatprep.subr.bf16.mxu0 %v653_v48 }
  0xe6   : > { %702 = vmatpush1.bf16.msra.mxu0 %v652_v49  ;;  %v1400_v49 = vld [vmem:[#allocation5] ss:$8 sps:$4 sm:$0xff]  }
  0xe7   : > { %v445_v54 = vpop.permute.xlu1 %444  ;;  %v443_v55 = vpop.permute.xlu0 %442 }
  0xe8   : > { %v448_v56 = vsel %vm446_vm6, %v441_v46, %v445_v54  ;;  %v450_v57 = vsel %vm446_vm6, %v445_v54, %v441_v46  ;;  %v447_v58 = vsel %vm446_vm6, %v439_v47, %v443_v55  ;;  %v449_v59 = vsel %vm446_vm6, %v443_v55, %v439_v47 }
  0xe9   : > { %v466_v60 = vmul.f32 %v1932_v52, %v450_v57  ;;  %v467_v61 = vmul.f32 %v1935_v53, %v448_v56  ;;  %v464_v62 = vmul.f32 %v1932_v52, %v449_v59  ;;  %v465_v63 = vmul.f32 %v1935_v53, %v447_v58 }
  0xeb   : > { %v410_v5 = vpop.permute.xlu1 %409  ;;  %v408_v6 = vpop.permute.xlu0 %407  ;;  %v651_v7 = vpack.c.bf16 %v467_v61, %v465_v63  ;;  %v650_v13 = vpack.c.bf16 %v466_v60, %v464_v62 }
  0xed   : > { %703 = vmatprep.subr.bf16.mxu0 %v651_v7 }
  0xee   : > { %704 = vmatpush1.bf16.msra.mxu0 %v650_v13 }
  0xef   : > { %v414_v18 = vpop.permute.xlu1 %413  ;;  %v412_v19 = vpop.permute.xlu0 %411 }
  0xf0   : > { %v419_v20 = vsel %vm417_vm7, %v410_v5, %v414_v18  ;;  %v421_v21 = vsel %vm417_vm7, %v414_v18, %v410_v5  ;;  %v418_v22 = vsel %vm417_vm7, %v408_v6, %v412_v19  ;;  %v420_v23 = vsel %vm417_vm7, %v412_v19, %v408_v6  ;;  %v1405_v19 = vld [vmem:[%s2304_s4 + $0x4] ss:$8 sps:$4 sm:$0xff]  }
  0xf1   : > { %v436_v24 = vmul.f32 %v1951_v14, %v421_v21  ;;  %v437_v25 = vmul.f32 %v1954_v15, %v419_v20  ;;  %v434_v26 = vmul.f32 %v1951_v14, %v420_v23  ;;  %v435_v27 = vmul.f32 %v1954_v15, %v418_v22  ;;  %1300 = vmatprep.mubr.msk.bf16.mxu1 %vm687_vm0, %v1405_v19  ;;  %v887_v20 = vld [vmem:[%s2305_s5 + $0x8] sm:$0xff]  ;;  %v886_v21 = vld [vmem:[%s2305_s5] sm:$0xff] }
  0xf3   : > { %v621_v29 = vpop.permute.xlu1 %620  ;;  %v619_v30 = vpop.permute.xlu0 %618  ;;  %v649_v35 = vpack.c.bf16 %v437_v25, %v435_v27  ;;  %v648_v36 = vpack.c.bf16 %v436_v24, %v434_v26 }
  0xf5   : > { %705 = vmatprep.subr.bf16.mxu0 %v649_v35 }
  0xf6   : > { %706 = vmatpush1.bf16.msra.mxu0 %v648_v36 }
  0xf7   : > { %v625_v39 = vpop.permute.xlu1 %624  ;;  %v623_v40 = vpop.permute.xlu0 %622 }
  0xf8   : > { %v628_v41 = vsel %vm626_vm8, %v621_v29, %v625_v39  ;;  %v630_v42 = vsel %vm626_vm8, %v625_v39, %v621_v29  ;;  %v627_v43 = vsel %vm626_vm8, %v619_v30, %v623_v40  ;;  %v629_v44 = vsel %vm626_vm8, %v623_v40, %v619_v30 }
  0xf9   : > { %v646_v11 = vmul.f32 %v1970_v37, %v628_v41  ;;  %v647_v12 = vmul.f32 %v1973_v38, %v630_v42  ;;  %v644_v45 = vmul.f32 %v1970_v37, %v627_v43  ;;  %v645_v46 = vmul.f32 %v1973_v38, %v629_v44 }
  0xfb   : > { %v665_v47 = vpack.c.bf16 %v647_v12, %v645_v46  ;;  %v664_v48 = vpack.c.bf16 %v646_v11, %v644_v45 }
  0xfd   : > { %721 = vmatprep.subr.bf16.mxu0 %v665_v47 }
  0xfe   : > { %722 = vmatpush2.bf16.msra.mxu0 %v664_v48 }
 0x101   : > { %724 = vmatmul.mubr.bf16.vlgmr.msra.gmra.mxu0 %v1400_v49 }
 0x102   : > { %1021 = vmatprep.mubr.f32.mxu0 %v1586_v10 }
 0x104   : > { %v671_v54 = vpop.permute.xlu0 %670  ;;  %v676_v58 = vpop.permute.xlu1 %675 }
 0x1c1   : > { %v725_v55 = vpop.f32.mrf.mxu0 }
 0x1c2   : > { %v726_v56 = vadd.f32 %v725_v55, %v671_v54 }
 0x1c3   : > { %v727_v57 = vpop.f32.mrf.mxu0 }
 0x1c4   : > { %v1987_v59 = vmax.f32 %v726_v56, 0.0  ;;  %v728_v61 = vadd.f32 %v727_v57, %v671_v54 }
 0x1c5   : > { %v729_v60 = vpop.f32.mrf.mxu0 }
 0x1c6   : > { %v730_v62 = vadd.f32 %v729_v60, %v676_v58  ;;  %836 = vrot.lane.b32.xlu1 %v1987_v59, %s1577_s26  ;;  %v1993_v6 = vmax.f32 %v728_v61, 0.0 }
 0x1c7   : > { %v731_v63 = vpop.f32.mrf.mxu0 }
 0x1c8   : > { %v1991_v4 = vmax.f32 %v730_v62, 0.0  ;;  %v732_v5 = vadd.f32 %v731_v63, %v676_v58 }
 0x1ca   : > { %v1995_v7 = vmax.f32 %v732_v5, 0.0  ;;  %838 = vrot.lane.b32.xlu0 %v1991_v4, %s1577_s26  ;;  %820 = vrot.lane.b32.xlu1 %v1987_v59, %s1578_s29  ;;  %v876_v13 = vpack.c.bf16 %v1991_v4, %v1987_v59 }
 0x1cc   : > { %v877_v18 = vpack.c.bf16 %v1995_v7, %v1993_v6 }
 0x1ce   : > { %822 = vrot.lane.b32.xlu0 %v1991_v4, %s1578_s29  ;;  %804 = vrot.lane.b32.xlu1 %v1987_v59, %s1579_s11 }
 0x1d2   : > { %806 = vrot.lane.b32.xlu0 %v1991_v4, %s1579_s11  ;;  %788 = vrot.lane.b32.xlu1 %v1987_v59, %s1580_s27 }
 0x1d6   : > { %790 = vrot.lane.b32.xlu0 %v1991_v4, %s1580_s27  ;;  %772 = vrot.lane.b32.xlu1 %v1987_v59, %s1581_s12 }
 0x1da   : > { %774 = vrot.lane.b32.xlu0 %v1991_v4, %s1581_s12  ;;  %756 = vrot.lane.b32.xlu1 %v1987_v59, %s1582_s18 }
 0x1de   : > { %758 = vrot.lane.b32.xlu0 %v1991_v4, %s1582_s18  ;;  %740 = vrot.lane.b32.xlu1 %v1987_v59, %s1583_s20 }
 0x1e2   : > { %742 = vrot.lane.b32.xlu0 %v1991_v4, %s1583_s20  ;;  %840 = vrot.lane.b32.xlu1 %v1993_v6, %s1577_s26 }
 0x1e6   : > { %842 = vrot.lane.b32.xlu0 %v1995_v7, %s1577_s26  ;;  %824 = vrot.lane.b32.xlu1 %v1993_v6, %s1578_s29  ;;  %s2254_s26 = scalar_lea.hbm %s2310_s10, %s1312_s22 }
 0x1ea   : > { %826 = vrot.lane.b32.xlu0 %v1995_v7, %s1578_s29  ;;  %808 = vrot.lane.b32.xlu1 %v1993_v6, %s1579_s11 }
 0x1ee   : > { %810 = vrot.lane.b32.xlu0 %v1995_v7, %s1579_s11  ;;  %852 = vrot.lane.b32.xlu1 %v1987_v59, %s1584_s21  ;;  %s1587_s11 = smov [#allocation8]  }
 0x1f2   : > { %854 = vrot.lane.b32.xlu0 %v1991_v4, %s1584_s21  ;;  %792 = vrot.lane.b32.xlu1 %v1993_v6, %s1580_s27 }
 0x1f6   : > { %794 = vrot.lane.b32.xlu0 %v1995_v7, %s1580_s27  ;;  %776 = vrot.lane.b32.xlu1 %v1993_v6, %s1581_s12  ;;  %s1504_s27 = sshll.u32 %s1587_s11, 4  ;;  %s1505_s27 = int_to_ptr.vmem [resolvable:$false] %s1504_s27 }
 0x1fa   : > { %778 = vrot.lane.b32.xlu0 %v1995_v7, %s1581_s12  ;;  %760 = vrot.lane.b32.xlu1 %v1993_v6, %s1582_s18  ;;  %s1506_s12 = scalar_lea.vmem %s1505_s27, 1024 }
 0x1fe   : > { %762 = vrot.lane.b32.xlu0 %v1995_v7, %s1582_s18  ;;  %744 = vrot.lane.b32.xlu1 %v1993_v6, %s1583_s20 }
 0x202   : > { %746 = vrot.lane.b32.xlu0 %v1995_v7, %s1583_s20  ;;  %856 = vrot.lane.b32.xlu1 %v1993_v6, %s1584_s21  ;;  %s392_s20 = sand.u32 1, %s1560_s14  }
 0x203   : > { %s2259_s17 = scalar_lea.sflag [#allocation4], %s392_s20 }
 0x206   : > { %858 = vrot.lane.b32.xlu0 %v1995_v7, %s1584_s21  ;;  %895 = vperm.xlu1 %1399, %v887_v20   ;;  %s1292_s21 = sshll.u32 %s392_s20, 5 }
 0x207   : > { %s394_s15 = scalar_lea.vmem [#allocation8], %s1292_s21 }
 0x208   : > { %s1189_s28 = sshll.u32 %s394_s15, 4  ;;  %s2257_s28 = int_to_ptr.vmem [resolvable:$true] %s1189_s28 }
 0x209   : > { %s1500_s29 = scalar_lea.vmem %s2257_s28, 512  ;;  %p1507_p6 = scmp.lt.s32.totalorder %s2257_s28, %s1505_s27 }
 0x20a   : > { %890 = vperm.xlu0 %1398, %v886_v21   ;;  %p1501_p10 = scmp.ne.s32.totalorder %s2257_s28, %s1500_s29  ;;  %p1508_p9 = scmp.lt.s32.totalorder %s1506_s12, %s1500_s29 }
 0x20c   : > { %p1502_p12 = pnand %p1501_p10, %p1682_p5  ;;  %p1509_p8 = por %p1508_p9, %p1507_p6 }
 0x20e   : > { %p1503_p7 = pneg %p1502_p12 }
 0x210   : > { %p1510_p11 = pnand %p1509_p8, %p1503_p7 }
 0x238   : > { %v837_v22 = vpop.permute.xlu1 %836 }
 0x23c   : > { %v839_v23 = vpop.permute.xlu0 %838  ;;  %v821_v24 = vpop.permute.xlu1 %820 }
 0x240   : > { %v823_v25 = vpop.permute.xlu0 %822  ;;  %v805_v26 = vpop.permute.xlu1 %804 }
 0x244   : > { %v807_v27 = vpop.permute.xlu0 %806  ;;  %v789_v28 = vpop.permute.xlu1 %788 }
 0x248   : > { %v791_v29 = vpop.permute.xlu0 %790  ;;  %v2073_v30 = vpop.permute.xlu1 %772 }
 0x24c   : > { %v2075_v35 = vpop.permute.xlu0 %774  ;;  %v2077_v36 = vpop.permute.xlu1 %756 }
 0x250   : > { %v2079_v39 = vpop.permute.xlu0 %758  ;;  %v2081_v40 = vpop.permute.xlu1 %740 }
 0x254   : > { %v2083_v41 = vpop.permute.xlu0 %742  ;;  %v841_v42 = vpop.permute.xlu1 %840 }
 0x255   : > { %v844_v43 = vsel %vm596_vm1, %v837_v22, %v841_v42  ;;  %v846_v44 = vsel %vm596_vm1, %v841_v42, %v837_v22 }
 0x256   : > { %v848_v47 = vmul.f32 %v844_v43, %v1833_v16  ;;  %v849_v49 = vmul.f32 %v846_v44, %v1836_v17 }
 0x258   : > { %v843_v11 = vpop.permute.xlu0 %842  ;;  %v825_v12 = vpop.permute.xlu1 %824 }
 0x259   : > { %v845_v45 = vsel %vm596_vm1, %v839_v23, %v843_v11  ;;  %v847_v46 = vsel %vm596_vm1, %v843_v11, %v839_v23  ;;  %v828_v55 = vsel %vm566_vm2, %v821_v24, %v825_v12  ;;  %v830_v56 = vsel %vm566_vm2, %v825_v12, %v821_v24 }
 0x25a   : > { %v850_v48 = vmul.f32 %v845_v45, %v1833_v16  ;;  %v851_v54 = vmul.f32 %v847_v46, %v1836_v17  ;;  %v832_v63 = vmul.f32 %v828_v55, %v1852_v33  ;;  %v833_v17 = vmul.f32 %v830_v56, %v1855_v34 }
 0x25c   : > { %v827_v57 = vpop.permute.xlu0 %826  ;;  %v809_v58 = vpop.permute.xlu1 %808  ;;  %v883_v60 = vpack.c.bf16 %v851_v54, %v849_v49  ;;  %v882_v61 = vpack.c.bf16 %v850_v48, %v848_v47 }
 0x25d   : > { %v829_v62 = vsel %vm566_vm2, %v823_v25, %v827_v57  ;;  %v831_v16 = vsel %vm566_vm2, %v827_v57, %v823_v25  ;;  %v812_v20 = vsel %vm536_vm3, %v805_v26, %v809_v58  ;;  %v814_v21 = vsel %vm536_vm3, %v809_v58, %v805_v26 }
 0x25e   : > { %v834_v5 = vmul.f32 %v829_v62, %v1852_v33  ;;  %v835_v19 = vmul.f32 %v831_v16, %v1855_v34  ;;  %910 = vmatprep.subr.bf16.mxu1 %v883_v60  ;;  %v816_v34 = vmul.f32 %v812_v20, %v1871_v50  ;;  %v817_v43 = vmul.f32 %v814_v21, %v1874_v51 }
 0x25f   : > { %911 = vmatpush1.bf16.msra.mxu1 %v882_v61 }
 0x260   : > { %v811_v22 = vpop.permute.xlu0 %810  ;;  %v2113_v23 = vpop.permute.xlu1 %852  ;;  %v881_v24 = vpack.c.bf16 %v835_v19, %v833_v17  ;;  %v880_v25 = vpack.c.bf16 %v834_v5, %v832_v63 }
 0x261   : > { %v813_v42 = vsel %vm536_vm3, %v807_v27, %v811_v22  ;;  %v815_v33 = vsel %vm536_vm3, %v811_v22, %v807_v27 }
 0x262   : > { %v818_v44 = vmul.f32 %v813_v42, %v1871_v50  ;;  %v819_v26 = vmul.f32 %v815_v33, %v1874_v51  ;;  %912 = vmatprep.subr.bf16.mxu1 %v881_v24 }
 0x263   : > { %913 = vmatpush1.bf16.msra.mxu1 %v880_v25 }
 0x264   : > { %v2123_v11 = vpop.permute.xlu0 %854  ;;  %v793_v12 = vpop.permute.xlu1 %792  ;;  %v879_v45 = vpack.c.bf16 %v819_v26, %v817_v43  ;;  %v878_v46 = vpack.c.bf16 %v818_v44, %v816_v34 }
 0x265   : > { %v796_v47 = vsel %vm506_vm4, %v789_v28, %v793_v12  ;;  %v798_v27 = vsel %vm506_vm4, %v793_v12, %v789_v28 }
 0x266   : > { %914 = vmatprep.subr.bf16.mxu1 %v879_v45  ;;  %v800_v54 = vmul.f32 %v798_v27, %v1892_v8  ;;  %v801_v55 = vmul.f32 %v796_v47, %v1895_v9 }
 0x267   : > { %915 = vmatpush1.bf16.msra.mxu1 %v878_v46 }
 0x268   : > { %v795_v48 = vpop.permute.xlu0 %794  ;;  %916 = vmatprep.subr.bf16.mxu1 %v877_v18  ;;  %v777_v50 = vpop.permute.xlu1 %776 }
 0x269   : > { %v797_v51 = vsel %vm506_vm4, %v791_v29, %v795_v48  ;;  %v799_v49 = vsel %vm506_vm4, %v795_v48, %v791_v29  ;;  %v780_v6 = vsel %vm476_vm5, %v2073_v30, %v777_v50  ;;  %v782_v7 = vsel %vm476_vm5, %v777_v50, %v2073_v30  ;;  %v1403_v50 = vld [vmem:[%s2304_s4] ss:$8 sps:$4 sm:$0xff]  }
 0x26a   : > { %v802_v56 = vmul.f32 %v799_v49, %v1892_v8  ;;  %v803_v28 = vmul.f32 %v797_v51, %v1895_v9  ;;  %v784_v60 = vmul.f32 %v782_v7, %v1913_v31  ;;  %v785_v30 = vmul.f32 %v780_v6, %v1916_v32  ;;  %v953_v7 = vld [vmem:[#allocation7] sm:$0xf] }
 0x26b   : > { %917 = vmatpush1.bf16.msra.mxu1 %v876_v13 }
 0x26c   : > { %v779_v18 = vpop.permute.xlu0 %778  ;;  %v761_v29 = vpop.permute.xlu1 %760  ;;  %v875_v57 = vpack.c.bf16 %v803_v28, %v801_v55  ;;  %v874_v58 = vpack.c.bf16 %v802_v56, %v800_v54 }
 0x26d   : > { %v781_v8 = vsel %vm476_vm5, %v2075_v35, %v779_v18  ;;  %v783_v9 = vsel %vm476_vm5, %v779_v18, %v2075_v35  ;;  %v764_v4 = vsel %vm446_vm6, %v2077_v36, %v761_v29  ;;  %v766_v13 = vsel %vm446_vm6, %v761_v29, %v2077_v36 }
 0x26e   : > { %v786_v61 = vmul.f32 %v783_v9, %v1913_v31  ;;  %v787_v59 = vmul.f32 %v781_v8, %v1916_v32  ;;  %918 = vmatprep.subr.bf16.mxu1 %v875_v57  ;;  %v768_v17 = vmul.f32 %v766_v13, %v1932_v52  ;;  %v769_v5 = vmul.f32 %v764_v4, %v1935_v53  ;;  %v1036_v9 = vld [vmem:[%s2307_s7] sm:$0xf]  ;;  %v1046_v13 = vld [vmem:[%s2309_s9 + $0x8] sm:$0xff] }
 0x26f   : > { %919 = vmatpush1.bf16.msra.mxu1 %v874_v58  ;;  %v1045_v4 = vld [vmem:[%s2309_s9] sm:$0xff] }
 0x270   : > { %v763_v62 = vpop.permute.xlu0 %762  ;;  %v745_v35 = vpop.permute.xlu1 %744  ;;  %v873_v16 = vpack.c.bf16 %v787_v59, %v785_v30  ;;  %v872_v63 = vpack.c.bf16 %v786_v61, %v784_v60 }
 0x271   : > { %v765_v31 = vsel %vm446_vm6, %v2079_v39, %v763_v62  ;;  %v767_v32 = vsel %vm446_vm6, %v763_v62, %v2079_v39  ;;  %v748_v20 = vsel %vm417_vm7, %v2081_v40, %v745_v35  ;;  %v750_v21 = vsel %vm417_vm7, %v745_v35, %v2081_v40  ;;  %v1039_v35 = vld [vmem:[%s2308_s8] sm:$0xff] }
 0x272   : > { %v770_v19 = vmul.f32 %v767_v32, %v1932_v52  ;;  %v771_v36 = vmul.f32 %v765_v31, %v1935_v53  ;;  %920 = vmatprep.subr.bf16.mxu1 %v873_v16  ;;  %v752_v42 = vmul.f32 %v750_v21, %v1951_v14  ;;  %v753_v33 = vmul.f32 %v748_v20, %v1954_v15  ;;  %v1040_v16 = vld [vmem:[%s2308_s8 + $0x8] sm:$0xff] }
 0x273   : > { %921 = vmatpush1.bf16.msra.mxu1 %v872_v63 }
 0x274   : > { %v747_v22 = vpop.permute.xlu0 %746  ;;  %v857_v39 = vpop.permute.xlu1 %856  ;;  %v871_v24 = vpack.c.bf16 %v771_v36, %v769_v5  ;;  %v870_v25 = vpack.c.bf16 %v770_v19, %v768_v17 }
 0x275   : > { %v749_v52 = vsel %vm417_vm7, %v2083_v41, %v747_v22  ;;  %v751_v53 = vsel %vm417_vm7, %v747_v22, %v2083_v41  ;;  %v860_v43 = vsel %vm626_vm8, %v2113_v23, %v857_v39  ;;  %v862_v44 = vsel %vm626_vm8, %v857_v39, %v2113_v23 }
 0x276   : > { %v754_v34 = vmul.f32 %v751_v53, %v1951_v14  ;;  %v755_v40 = vmul.f32 %v749_v52, %v1954_v15  ;;  %922 = vmatprep.subr.bf16.mxu1 %v871_v24  ;;  %v864_v15 = vmul.f32 %v860_v43, %v1970_v37  ;;  %v865_v46 = vmul.f32 %v862_v44, %v1973_v38 }
 0x277   : > { %923 = vmatpush1.bf16.msra.mxu1 %v870_v25 }
 0x278   : > { %v859_v26 = vpop.permute.xlu0 %858  ;;  %v869_v41 = vpack.c.bf16 %v755_v40, %v753_v33  ;;  %v868_v12 = vpack.c.bf16 %v754_v34, %v752_v42 }
 0x279   : > { %v861_v45 = vsel %vm626_vm8, %v2123_v11, %v859_v26  ;;  %v863_v14 = vsel %vm626_vm8, %v859_v26, %v2123_v11 }
 0x27a   : > { %v866_v47 = vmul.f32 %v861_v45, %v1970_v37  ;;  %v867_v23 = vmul.f32 %v863_v14, %v1973_v38  ;;  %924 = vmatprep.subr.bf16.mxu1 %v869_v41 }
 0x27b   : > { %925 = vmatpush1.bf16.msra.mxu1 %v868_v12 }
 0x27c   : > { %v885_v27 = vpack.c.bf16 %v867_v23, %v865_v46  ;;  %v884_v48 = vpack.c.bf16 %v866_v47, %v864_v15 }
 0x27e   : > { %940 = vmatprep.subr.bf16.mxu1 %v885_v27 }
 0x27f   : > { %941 = vmatpush2.bf16.msra.mxu1 %v884_v48 }
 0x281   : > { %v896_v37 = vpop.permute.xlu1 %895 }
 0x282   : > { %943 = vmatmul.mubr.bf16.vlgmr.msra.gmra.mxu1 %v1403_v50 }
 0x283   : > { %1130 = vmatprep.mubr.f32.mxu1 %v1586_v10 }
 0x285   : > { %v891_v55 = vpop.permute.xlu0 %890 }
 0x342   : > { %v944_v11 = vpop.f32.mrf.mxu1 }
 0x343   : > { %v2217_v6 = vadd.f32 %v944_v11, %v891_v55 }
 0x344   : > { %v946_v51 = vpop.f32.mrf.mxu1 }
 0x345   : > { %v2214_v28 = vadd.f32 %v946_v51, %v891_v55 }
 0x346   : > { %v948_v49 = vpop.f32.mrf.mxu1 }
 0x347   : > { %v2212_v56 = vadd.f32 %v948_v49, %v896_v37 }
 0x348   : > { %v950_v54 = vpop.f32.mrf.mxu1 }
 0x349   : > { %v2210_v38 = vadd.f32 %v950_v54, %v896_v37 }
 0x34b   : > { %985 = vmatprep.subr.mxu0 %v2210_v38 }
 0x34c   : > { %986 = vmatpush1.msra.mxu0 %v2212_v56 }
 0x34d   : > { %987 = vmatprep.subr.mxu0 %v2214_v28 }
 0x34e   : > { %988 = vmatpush1.msra.mxu0 %v2217_v6 }
 0x34f   : > { %1301 = vmatmul.mubr.msk.f32.vlgmr.msra.gmra.mxu0 %vm687_vm0, %v953_v7 }
 0x40f   : > { %v1023_v18 = vpop.f32.mrf.mxu0 }
 0x410   : > { %v1029_v57 = vsel %vm1028_vm9, %v1023_v18, 0.0 }
 0x411   : > { %v1025_v29 = vpop.f32.mrf.mxu0 }
 0x412   : > { %v1030_v58 = vsel %vm1028_vm9, %v1025_v29, 0.0 }
 0x413   : > { %v1031_v8 = vadd.f32 %v1030_v58, %v1029_v57 }
 0x415   : > { %1032 = vadd.xlane.f32.xlu1 %v1031_v8 }
 0x49e   : > { %v1033_v60 = vpop.xlane.xlu1 %1032 }
 0x49f   : > { %v1035_v30 = vmul.f32 0.00390625, %v1033_v60 }
 0x4a1   : > { %v1037_v61 = vadd.f32 %v1036_v9, %v1035_v30 }
 0x4a3   : > { %v1038_v59 = vmax.f32 %v1037_v61, 0.0 }
 0x4a5   : > { %1043 = vperm.xlu0 %1398, %v1038_v59  }
 0x4a9   : > { %1049 = vperm.xlu0 %1398, %v1045_v4  }
 0x4ad   : > { %1054 = vperm.xlu0 %1398, %v1046_v13  }
 0x520   : > { %v1044_v62 = vpop.permute.xlu0 %1043 }
 0x521   : > { %1302 = vmatprep.subr.msk.mxu1 %vm1028_vm9, %v1044_v62 }
 0x522   : > { %1303 = vmatpush1.msk.msra.mxu1 %vm1028_vm9, %v1044_v62 }
 0x523   : > { %1304 = vmatmul.mubr.msk.f32.vlgmr.msra.gmra.mxu1 %vm1057_vm10, %v1039_v35 }
 0x524   : > { %1136 = vmatprep.mubr.f32.mxu1 %v1586_v10  ;;  %v1050_v63 = vpop.permute.xlu0 %1049 }
 0x527   : > { %1305 = vmatmul.mubr.msk.f32.gmra.mxu1 %vm1057_vm10, %v1040_v16 }
 0x528   : > { %v1055_v36 = vpop.permute.xlu0 %1054 }
 0x5e3   : > { %v1132_v31 = vpop.f32.mrf.mxu1 }
 0x5e4   : > { %v1133_v32 = vadd.f32 %v1132_v31, %v1050_v63 }
 0x5e5   : > { %v1134_v17 = vpop.f32.mrf.mxu1 }
 0x5e6   : > { %v1143_v5 = vsub.f32 0.0, %v1133_v32  ;;  %v1135_v19 = vadd.f32 %v1134_v17, %v1050_v63 }
 0x5e7   : > { %v1138_v20 = vpop.f32.mrf.mxu1 }
 0x5e8   : > { %v1147_v21 = vmul.f32 1.442695, %v1143_v5  ;;  %v1144_v22 = vsub.f32 0.0, %v1135_v19  ;;  %v1139_v39 = vadd.f32 %v1138_v20, %v1055_v36 }
 0x5e9   : > { %v1140_v24 = vpop.f32.mrf.mxu1 }
 0x5ea   : > { %1406 = vpow2.f32 %v1147_v21  ;;  %v1149_v25 = vmul.f32 1.442695, %v1144_v22  ;;  %v1145_v52 = vsub.f32 0.0, %v1139_v39  ;;  %v1141_v53 = vadd.f32 %v1140_v24, %v1055_v36 }
 0x5ec   : > { %1408 = vpow2.f32 %v1149_v25  ;;  %v1151_v42 = vmul.f32 1.442695, %v1145_v52  ;;  %v1146_v33 = vsub.f32 0.0, %v1141_v53 }
 0x5ee   : > { %1410 = vpow2.f32 %v1151_v42  ;;  %v1153_v34 = vmul.f32 1.442695, %v1146_v33 }
 0x5f0   : > { %1412 = vpow2.f32 %v1153_v34 }
 0x5f7   : > { %v1407_v40 = vpop.eup %1406 }
 0x5f8   : > { %v1155_v43 = vadd.f32 1.0, %v1407_v40 }
 0x5f9   : > { %v1409_v44 = vpop.eup %1408 }
 0x5fa   : > { %1414 = vrcp.f32 %v1155_v43  ;;  %v1156_v26 = vadd.f32 1.0, %v1409_v44 }
 0x5fb   : > { %v1411_v41 = vpop.eup %1410 }
 0x5fc   : > { %1416 = vrcp.f32 %v1156_v26  ;;  %v1157_v12 = vadd.f32 1.0, %v1411_v41 }
 0x5fd   : > { %v1413_v45 = vpop.eup %1412 }
 0x5fe   : > { %1418 = vrcp.f32 %v1157_v12  ;;  %v1158_v14 = vadd.f32 1.0, %v1413_v45 }
 0x600   : > { %1420 = vrcp.f32 %v1158_v14 }
 0x607   : > { %v1415_v15 = vpop.eup %1414 }
 0x608   : > { %v1163_v46 = vmul.f32 %v1415_v15, %v2217_v6 }
 0x609   : > { %v1417_v47 = vpop.eup %1416 }
 0x60a   : > { %v1167_v23 = vadd.f32 %v1163_v46, %v1748_v1  ;;  %v1164_v27 = vmul.f32 %v1417_v47, %v2214_v28 }
 0x60b   : > { %v1419_v48 = vpop.eup %1418 }
 0x60c   : > { %v1168_v50 = vadd.f32 %v1164_v27, %v1746_v0  ;;  %v1165_v10 = vmul.f32 %v1419_v48, %v2212_v56  ;;  %1171 = vst [vmem:[%s394_s15] sm:$0xff] %v1167_v23 }
 0x60d   : > { %v1421_v11 = vpop.eup %1420 }
 0x60e   : > { %v1169_v51 = vadd.f32 %v1165_v10, %v1756_v3  ;;  %v1166_v49 = vmul.f32 %v1421_v11, %v2210_v38  ;;  %1172 = vst [vmem:[%s394_s15 + $0x8] sm:$0xff] %v1168_v50 }
 0x610   : > { %v1170_v0 = vadd.f32 %v1166_v49, %v1754_v2  ;;  %1173 = vst [vmem:[%s394_s15 + $0x10] sm:$0xff] %v1169_v51 }
 0x612   : > { %1174 = vst [vmem:[%s394_s15 + $0x18] sm:$0xff] %v1170_v0 }
 0x613   : > { %1513 = shalt.err (!%p1510_p11)
}
 0x614   : > { %s1514_s20 = scalar_lea.hbm %s2254_s26, 512  ;;  %s1518_s22 = scalar_lea.hbm %s2310_s10, 1024 }
 0x615   : > { %p1515_p0 = scmp.ne.s32.totalorder %s2254_s26, %s1514_s20  ;;  %p1519_p3 = scmp.lt.s32.totalorder %s2254_s26, %s2310_s10 }
 0x616   : > { %p1520_p2 = scmp.lt.s32.totalorder %s1518_s22, %s1514_s20 }
 0x617   : > { %p1516_p1 = pnand %p1515_p0, %p1682_p5 }
 0x618   : > { %p1521_p4 = por %p1520_p2, %p1519_p3 }
 0x619   : > { %p1517_p13 = pneg %p1516_p1 }
 0x61b   : > { %p1522_p10 = pnand %p1521_p4, %p1517_p13 }
 0x61d   : > { %1525 = shalt.err (!%p1522_p10)
}
 0x61e   : > { %s1588_s29 = smov 256  }
 0x61f   : > { %1325 = dma.vmem_to_hbm [thread:$0]  (%p1682_p5), %s2257_s28, 512, %s2254_s26, %s2259_s17, %s1588_s29, %s1588_s29, %s1582_s18  }
 0x620 PF: > { %p1347_p12 = scmp.ge.s32.totalorder %s1568_s16, 2  ;;  %s1204_s11 = sand.u32 1, %s1556_s13  }
 0x621   : > { %p2323_p7 = scmp.ne.s32.totalorder %s2316_s24, 0  ;;  %s1205_s27 = scalar_lea.sflag [#allocation4], %s1204_s11 }
 0x623   : > { %p1338_p6 = pnand %p1347_p12, %p2323_p7 }
 0x625   : > { %p1339_p9 = pneg %p1338_p6 }
 0x627   : > { %1551 = dma.done.wait (%p1339_p9), %s1205_s27, 512  }
 0x628   : > { %1553 = vsyncadd (%p1339_p9), %s1205_s27, 4294966784  ;;  %s2324_s23 = sld [smem:[#allocation12_spill]]  ;;  %p22_p8 = scmp.ge.s32.totalorder %s1669_s19, 4  }
 0x629   : > { %s2325_s15 = sld [smem:[#allocation13_spill]]  ;;  %s2326_s13 = smov %s1560_s14 }
 0x62a   : > { %s2328_s16 = smov %s1669_s19  ;;  %24 = sbr.rel (!%p22_p8) target bundleno = 5 (0x5), region = 115 }
 0x62e   : > { %s2327_s14 = smov %s2324_s23 }
 0x62f   :  { %1210 = vsyncpa [#allocation3], 1 }
 0x630   :  { %1212 = vsyncpa [#allocation3 + $0x1], 1 }
 0x631   :  { %1213 = vsyncpa [#allocation6], 1 }
 0x632   :  { %1214 = vsyncpa [#allocation4], 1 }
 0x633   :  { %1216 = vsyncpa [#allocation4 + $0x1], 1 }

</bundles_post_ra>
